<compile_context>
chip_gen: v7x
topology: tpu7x:2x2x1
jax: 0.10.0
libtpu: 0.0.40
codegen_flags: <defaults>
</compile_context>

<pallas_src>
import functools

import jax
import jax.numpy as jnp
from jax.experimental import pallas as pl
from jax.experimental.pallas import tpu as pltpu


def _round_up(x, m):
    return ((x + m - 1) // m) * m


def dh_net_kernel(state_ref, w1_ref, b1_ref, wo_ref, bo_ref, out_ref,
                  *, asset_dim, matmul_dtype):
    state = state_ref[...]
    if matmul_dtype is not None:
        # In-kernel cast rides the abundant VPU slack and is hidden under DMA;
        # avoids a separate wrapper-side HBM pass over state.
        state = state.astype(matmul_dtype)

    # hidden = relu(state @ w1 + b1)   (f32 accumulation on the MXU)
    x = jnp.dot(state, w1_ref[...], preferred_element_type=jnp.float32)
    x = jnp.maximum(x + b1_ref[...], 0.0)

    # y1 = x @ wo + bo   (wo/bo lane-padded to 128 for the MXU; pad cols are 0)
    y1 = jnp.dot(x.astype(wo_ref.dtype), wo_ref[...],
                 preferred_element_type=jnp.float32)
    y1 = y1 + bo_ref[...]

    # Conditional L1 normalize: where(norm > 1, y1 / norm, y1)
    #   == y1 * (1 / max(norm, 1)).  Pad columns are exactly zero, so they do
    # not contribute to the norm.
    norm = jnp.sum(jnp.abs(y1), axis=-1, keepdims=True)          # (tile_b, 1)
    inv = pl.reciprocal(jnp.maximum(norm, 1.0), approx=False)
    y1 = y1 * inv

    # Store only the real asset_dim columns -> no 32x HBM write amplification.
    out_ref[...] = y1[:, :asset_dim].astype(out_ref.dtype)


def dh_net_forward(state, w1, b1, wo, bo, *, tile_b=1024, matmul_dtype=None):
    """Forward pass of DH_Net (twolayered=False) as a single pallas_call."""
    B, num_state = state.shape
    hidden = w1.shape[1]
    asset_dim = wo.shape[1]

    # ---- lane-dense MXU operands: pad wo/bo columns up to a multiple of 128.
    # (Tiny; hoist out of the per-call path if weights are reused across calls.)
    asset_pad = max(128, _round_up(asset_dim, 128))
    if asset_pad != asset_dim:
        wo_p = jnp.zeros((hidden, asset_pad), wo.dtype).at[:, :asset_dim].set(wo)
        bo_p = jnp.zeros((1, asset_pad), bo.dtype).at[:, :asset_dim].set(bo)
    else:
        wo_p, bo_p = wo, bo

    w1_c, wo_c = w1, wo_p
    if matmul_dtype is not None:
        # Pre-cast only the grid-resident weights; state is cast in-kernel.
        w1_c = w1.astype(matmul_dtype)
        wo_c = wo_p.astype(matmul_dtype)

    # ---- batch tiling: no wrapper-side padding, ragged tail handled by Pallas.
    tile_b = max(8, min(_round_up(tile_b, 8), _round_up(B, 8)))
    if B > tile_b:
        # v7x dual-TC: guarantee >= 2 balanced grid steps on the parallel axis.
        tile_b = max(8, min(tile_b, _round_up(pl.cdiv(B, 2), 8)))
    grid = (pl.cdiv(B, tile_b),)

    kernel = functools.partial(
        dh_net_kernel, asset_dim=asset_dim, matmul_dtype=matmul_dtype)

    cost = pl.CostEstimate(
        flops=2 * B * num_state * hidden + 2 * B * hidden * asset_pad,
        transcendentals=B,
        bytes_accessed=(B * num_state * 4 + B * asset_dim * 4
                        + num_state * hidden * 4 + hidden * 4
                        + hidden * asset_pad * 4 + asset_pad * 4),
    )

    out = pl.pallas_call(
        kernel,
        out_shape=jax.ShapeDtypeStruct((B, asset_dim), jnp.float32),
        grid=grid,
        in_specs=[
            # streamed per grid step
            pl.BlockSpec((tile_b, num_state), lambda i: (i, 0)),
            # grid-resident weights/biases (constant block index -> no re-DMA)
            pl.BlockSpec((num_state, hidden), lambda i: (0, 0)),
            pl.BlockSpec((1, hidden), lambda i: (0, 0)),
            pl.BlockSpec((hidden, asset_pad), lambda i: (0, 0)),
            pl.BlockSpec((1, asset_pad), lambda i: (0, 0)),
        ],
        out_specs=pl.BlockSpec((tile_b, asset_dim), lambda i: (i, 0)),
        compiler_params=pltpu.CompilerParams(
            dimension_semantics=("parallel",)),
        cost_estimate=cost,
    )(state, w1_c, b1, wo_c, bo_p)

    return out


def make_params(key, num_state, asset_dim, hidden=128):
    k1, k2, k3, k4 = jax.random.split(key, 4)
    bound1 = 1.0 / jnp.sqrt(num_state)
    bound2 = 1.0 / jnp.sqrt(hidden)
    w1 = jax.random.uniform(k1, (num_state, hidden), jnp.float32, -bound1, bound1)
    b1 = jax.random.uniform(k2, (1, hidden), jnp.float32, -bound1, bound1)
    wo = jax.random.uniform(k3, (hidden, asset_dim), jnp.float32, -bound2, bound2)
    bo = jax.random.uniform(k4, (1, asset_dim), jnp.float32, -bound2, bound2)
    return w1, b1, wo, bo


def reference_forward(state, w1, b1, wo, bo):
    x = jnp.maximum(state @ w1 + b1, 0.0)
    y1 = x @ wo + bo
    norm = jnp.sum(jnp.abs(y1), axis=-1, keepdims=True)
    return jnp.where(norm > 1.0, y1 / norm, y1)


if __name__ == "__main__":
    # TODO(synk): twolayered=True branch (second 128x128 Linear+ReLU) not
    # implemented; the constructor default is twolayered=False.
    num_state, asset_dim, batch = 32, 4, 8

    key = jax.random.PRNGKey(0)
    kparams, kstate, kbig = jax.random.split(key, 3)
    w1, b1, wo, bo = make_params(kparams, num_state, asset_dim)
    state = jax.random.normal(kstate, (batch, num_state), jnp.float32)

    # Small-batch, f32 path (tight tolerance vs. reference).
    out = jax.block_until_ready(dh_net_forward(state, w1, b1, wo, bo))
    ref = reference_forward(state, w1, b1, wo, bo)
    assert out.shape == (batch, asset_dim)
    assert jnp.allclose(out, ref, atol=1e-5, rtol=1e-5)

    # Larger ragged batch: exercises the ragged tail block (1000 rows, no
    # wrapper-side padding) and resident weights.
    big_state = jax.random.normal(kbig, (1000, num_state), jnp.float32)
    out_big = jax.block_until_ready(dh_net_forward(big_state, w1, b1, wo, bo))
    ref_big = reference_forward(big_state, w1, b1, wo, bo)
    assert out_big.shape == (1000, asset_dim)
    assert jnp.allclose(out_big, ref_big, atol=1e-5, rtol=1e-5)

    # Multi-step grid (>= 2 balanced tiles) with bf16 matmul inputs cast
    # inside the kernel; looser tolerance.
    out_bf16 = jax.block_until_ready(
        dh_net_forward(big_state, w1, b1, wo, bo, tile_b=512,
                       matmul_dtype=jnp.bfloat16))
    assert jnp.allclose(out_bf16, ref_big, atol=2e-2, rtol=2e-2)

    print("KERNEL_OK")
</pallas_src>

<mosaic_0001>
module attributes {stable_mosaic.version = 11 : i64} {
  func.func @dh_net_kernel(%arg0: i32, %arg1: memref<8x32xf32, #tpu.memory_space<vmem>>, %arg2: memref<32x128xf32, #tpu.memory_space<vmem>>, %arg3: memref<1x128xf32, #tpu.memory_space<vmem>>, %arg4: memref<128x128xf32, #tpu.memory_space<vmem>>, %arg5: memref<1x128xf32, #tpu.memory_space<vmem>>, %arg6: memref<8x4xf32, #tpu.memory_space<vmem>>) attributes {dimension_semantics = [#tpu.dimension_semantics<parallel>], iteration_bounds = array<i64: 1>, scalar_prefetch = 0 : i64, scratch_operands = 0 : i64, tpu.core_type = #tpu.core_type<tc>, window_params = [{transform_indices = @transform_0, window_bounds = array<i64: 8, 32>}, {pipeline_mode = #tpu.pipeline_mode<synchronous>, transform_indices = @transform_1, window_bounds = array<i64: 32, 128>}, {pipeline_mode = #tpu.pipeline_mode<synchronous>, transform_indices = @transform_2, window_bounds = array<i64: 1, 128>}, {pipeline_mode = #tpu.pipeline_mode<synchronous>, transform_indices = @transform_3, window_bounds = array<i64: 128, 128>}, {pipeline_mode = #tpu.pipeline_mode<synchronous>, transform_indices = @transform_4, window_bounds = array<i64: 1, 128>}, {transform_indices = @transform_5, window_bounds = array<i64: 8, 4>}]} {
    %c0 = arith.constant 0 : index
    %c0_0 = arith.constant 0 : index
    %0 = vector.load %arg1[%c0, %c0_0] : memref<8x32xf32, #tpu.memory_space<vmem>>, vector<8x32xf32>
    %c0_1 = arith.constant 0 : index
    %c0_2 = arith.constant 0 : index
    %1 = vector.load %arg2[%c0_1, %c0_2] : memref<32x128xf32, #tpu.memory_space<vmem>>, vector<32x128xf32>
    %cst = arith.constant dense<0.000000e+00> : vector<8x128xf32>
    %2 = tpu.matmul %0, %1, %cst {dimension_numbers = #tpu.dot_dimension_numbers<[1], [0], [0], [1], [0, 0, 1, 1], [], []>} : vector<8x32xf32>, vector<32x128xf32>, vector<8x128xf32> -> vector<8x128xf32>
    %c0_3 = arith.constant 0 : index
    %c0_4 = arith.constant 0 : index
    %3 = vector.load %arg3[%c0_3, %c0_4] : memref<1x128xf32, #tpu.memory_space<vmem>>, vector<1x128xf32>
    %4 = vector.broadcast %3 : vector<1x128xf32> to vector<8x128xf32>
    %5 = arith.addf %2, %4 : vector<8x128xf32>
    %cst_5 = arith.constant 0.000000e+00 : f32
    %6 = vector.broadcast %cst_5 : f32 to vector<8x128xf32>
    %7 = arith.maximumf %5, %6 : vector<8x128xf32>
    %c0_6 = arith.constant 0 : index
    %c0_7 = arith.constant 0 : index
    %8 = vector.load %arg4[%c0_6, %c0_7] : memref<128x128xf32, #tpu.memory_space<vmem>>, vector<128x128xf32>
    %cst_8 = arith.constant dense<0.000000e+00> : vector<8x128xf32>
    %9 = tpu.matmul %7, %8, %cst_8 {dimension_numbers = #tpu.dot_dimension_numbers<[1], [0], [0], [1], [0, 0, 1, 1], [], []>} : vector<8x128xf32>, vector<128x128xf32>, vector<8x128xf32> -> vector<8x128xf32>
    %c0_9 = arith.constant 0 : index
    %c0_10 = arith.constant 0 : index
    %10 = vector.load %arg5[%c0_9, %c0_10] : memref<1x128xf32, #tpu.memory_space<vmem>>, vector<1x128xf32>
    %11 = vector.broadcast %10 : vector<1x128xf32> to vector<8x128xf32>
    %12 = arith.addf %9, %11 : vector<8x128xf32>
    %13 = math.absf %12 : vector<8x128xf32>
    %cst_11 = arith.constant dense<0.000000e+00> : vector<8xf32>
    %14 = vector.multi_reduction <add>, %13, %cst_11 [1] : vector<8x128xf32> to vector<8xf32>
    %15 = vector.shape_cast %14 : vector<8xf32> to vector<8x1xf32>
    %cst_12 = arith.constant 1.000000e+00 : f32
    %16 = vector.broadcast %cst_12 : f32 to vector<8x1xf32>
    %17 = arith.maximumf %15, %16 : vector<8x1xf32>
    %18 = tpu.reciprocal %17 : vector<8x1xf32> -> vector<8x1xf32>
    %19 = vector.broadcast %18 : vector<8x1xf32> to vector<8x128xf32>
    %20 = arith.mulf %12, %19 : vector<8x128xf32>
    %21 = vector.extract_strided_slice %20 {offsets = [0, 0], sizes = [8, 4], strides = [1, 1]} : vector<8x128xf32> to vector<8x4xf32>
    %c0_13 = arith.constant 0 : index
    %c0_14 = arith.constant 0 : index
    %22 = vector.load %arg6[%c0_13, %c0_14] : memref<8x4xf32, #tpu.memory_space<vmem>>, vector<8x4xf32>
    tpu.vector_store %arg6[%c0_13, %c0_14], %21 {strides = array<i32>} : memref<8x4xf32, #tpu.memory_space<vmem>>, vector<8x4xf32>,
    return
  }
  func.func @transform_0(%arg0: i32) -> (i32, i32) {
    %c0_i32 = arith.constant 0 : i32
    %c0_i32_0 = arith.constant 0 : i32
    return %arg0, %c0_i32 : i32, i32
  }
  func.func @transform_1(%arg0: i32) -> (i32, i32) {
    %c0_i32 = arith.constant 0 : i32
    %c0_i32_0 = arith.constant 0 : i32
    %c0_i32_1 = arith.constant 0 : i32
    return %c0_i32, %c0_i32_0 : i32, i32
  }
  func.func @transform_2(%arg0: i32) -> (i32, i32) {
    %c0_i32 = arith.constant 0 : i32
    %c0_i32_0 = arith.constant 0 : i32
    %c0_i32_1 = arith.constant 0 : i32
    return %c0_i32, %c0_i32_0 : i32, i32
  }
  func.func @transform_3(%arg0: i32) -> (i32, i32) {
    %c0_i32 = arith.constant 0 : i32
    %c0_i32_0 = arith.constant 0 : i32
    %c0_i32_1 = arith.constant 0 : i32
    return %c0_i32, %c0_i32_0 : i32, i32
  }
  func.func @transform_4(%arg0: i32) -> (i32, i32) {
    %c0_i32 = arith.constant 0 : i32
    %c0_i32_0 = arith.constant 0 : i32
    %c0_i32_1 = arith.constant 0 : i32
    return %c0_i32, %c0_i32_0 : i32, i32
  }
  func.func @transform_5(%arg0: i32) -> (i32, i32) {
    %c0_i32 = arith.constant 0 : i32
    %c0_i32_0 = arith.constant 0 : i32
    return %arg0, %c0_i32 : i32, i32
  }
}

</mosaic_0001>

<bundles_post_ra>
// kernel: tpu_custom_call.1
= control target key start
LH: loop header
LB: loop body
LE: loop exit
PB: predicated region body
PF: predicated region fallthrough
CT: control target
= control target key end

     0   :  { %10 = vsyncpa [#allocation3], 0  ;;  %s523_s0 = inlined_call_operand.hbm [shape: f32[8,32], index: 0, kind: input, shape index: {}]   ;;  %s524_s1 = inlined_call_operand.hbm [shape: f32[32,128], index: 1, kind: input, shape index: {}]   ;;  %s525_s2 = inlined_call_operand.vmem [shape: f32[1,128], index: 2, kind: input, shape index: {}]   ;;  %s526_s3 = inlined_call_operand.hbm [shape: f32[128,128], index: 3, kind: input, shape index: {}]   ;;  %s527_s4 = inlined_call_operand.vmem [shape: f32[1,128], index: 4, kind: input, shape index: {}]   ;;  %s528_s5 = inlined_call_operand.vmem [shape: f32[8,4], index: 5, kind: output, shape index: {}]  }
   0x1   :  { %11 = vsyncpa [#allocation5], 0  ;;  %s434_s18 = smov [#allocation4]   ;;  %s364_s22 = scalar_lea.hbm %s524_s1, 512 }
   0x2   :  { %s27_s19 = sshll.u32 %s434_s18, 4  ;;  %p365_p0 = scmp.ne.s32.totalorder %s524_s1, %s364_s22  ;;  %s28_s19 = int_to_ptr.vmem [resolvable:$true] %s27_s19 }
   0x3   :  { %p368_p1 = scmp.lt.u32.totalorder %s364_s22, %s524_s1 }
   0x5   :  { %p370_p2 = pnand %p368_p1, %p365_p0 }
   0x7   :  { %373 = shalt.err (!%p370_p2)
}
   0x8   :  { %s374_s27 = scalar_lea.vmem %s28_s19, 512  ;;  %p379_p4 = scmp.lt.s32.totalorder %s28_s19, %s28_s19 }
   0x9   :  { %p375_p3 = scmp.ne.s32.totalorder %s28_s19, %s374_s27  ;;  %p380_p5 = scmp.lt.s32.totalorder %s374_s27, %s374_s27 }
   0xb   :  { %p381_p6 = por %p380_p5, %p379_p4 }
   0xd   :  { %p382_p7 = pnand %p381_p6, %p375_p3 }
   0xf   :  { %385 = shalt.err (!%p382_p7)
}
  0x10   :  { %s435_s28 = smov 128   ;;  %s436_s29 = smov 8  }
  0x11   :  { %33 = dma.hbm_to_vmem [thread:$0]  %s524_s1, 512, %s28_s19, [#allocation5], %s435_s28, %s435_s28, %s436_s29  }
  0x12   :  { %s437_s7 = smov [#allocation2]   ;;  %s438_s9 = smov [#allocation6]  }
  0x13   :  { %s18_s8 = sshll.u32 %s437_s7, 4  ;;  %s41_s10 = sshll.u32 %s438_s9, 4  ;;  %s19_s8 = int_to_ptr.vmem [resolvable:$true] %s18_s8  ;;  %s42_s10 = int_to_ptr.vmem [resolvable:$true] %s41_s10 }
  0x14   :  { %s386_s13 = scalar_lea.hbm %s523_s0, 128 }
  0x15   :  { %p387_p8 = scmp.ne.s32.totalorder %s523_s0, %s386_s13  ;;  %p390_p9 = scmp.lt.u32.totalorder %s386_s13, %s523_s0 }
  0x17   :  { %p392_p10 = pnand %p390_p9, %p387_p8 }
  0x19   :  { %395 = shalt.err (!%p392_p10)
}
  0x1a   :  { %s396_s1 = scalar_lea.vmem %s19_s8, 128  ;;  %p401_p12 = scmp.lt.s32.totalorder %s19_s8, %s19_s8 }
  0x1b   :  { %p397_p11 = scmp.ne.s32.totalorder %s19_s8, %s396_s1  ;;  %p402_p13 = scmp.lt.s32.totalorder %s396_s1, %s396_s1 }
  0x1d   :  { %p403_p0 = por %p402_p13, %p401_p12 }
  0x1f   :  { %p404_p1 = pnand %p403_p0, %p397_p11 }
  0x21   :  { %407 = shalt.err (!%p404_p1)
}
  0x22   :  { %21 = dma.hbm_to_vmem [thread:$0]  %s523_s0, 128, %s19_s8, [#allocation3]  }
  0x23   :  { %s408_s22 = scalar_lea.hbm %s526_s3, 2048 }
  0x24   :  { %p409_p2 = scmp.ne.s32.totalorder %s526_s3, %s408_s22  ;;  %p412_p3 = scmp.lt.u32.totalorder %s408_s22, %s526_s3 }
  0x26   :  { %p414_p4 = pnand %p412_p3, %p409_p2 }
  0x28   :  { %417 = shalt.err (!%p414_p4)
}
  0x29   :  { %s418_s27 = scalar_lea.vmem %s42_s10, 2048  ;;  %p423_p6 = scmp.lt.s32.totalorder %s42_s10, %s42_s10 }
  0x2a   :  { %p419_p5 = scmp.ne.s32.totalorder %s42_s10, %s418_s27  ;;  %p424_p7 = scmp.lt.s32.totalorder %s418_s27, %s418_s27 }
  0x2c   :  { %p425_p8 = por %p424_p7, %p423_p6 }
  0x2e   :  { %p426_p9 = pnand %p425_p8, %p419_p5 }
  0x30   :  { %429 = shalt.err (!%p426_p9)
}
  0x31   :  { %47 = dma.hbm_to_vmem [thread:$0]  %s526_s3, 2048, %s42_s10, [#allocation5], %s435_s28, %s435_s28, %s436_s29  }
  0x32   :  { %430 = dma.done.wait [#allocation3], 128  }
  0x33   :  { %431 = vsyncadd [#allocation3], 4294967168 }
  0x34   :  { %432 = dma.done.wait [#allocation5], 2560  }
  0x35   :  { %433 = vsyncadd [#allocation5], 4294964736  ;;  %v439_v0 = vmov 0.0|0.0   ;;  %vm440_vm0 = vmmov 0   ;;  %v441_v1 = vmov 0.0   ;;  %v60_v2 = vld [vmem:[#allocation4] sm:$0xff] }
  0x36   :  { %324 = vmatprep.subr.bf16.mxu0 %v439_v0  ;;  %286 = vmatprep.mubr.msk.f32.mxu0 %vm440_vm0, %v441_v1  ;;  %v61_v3 = vld [vmem:[#allocation4 + $0x8] sm:$0xff]  ;;  %v62_v4 = vld [vmem:[#allocation4 + $0x10] sm:$0xff]  ;;  %v63_v6 = vld [vmem:[#allocation4 + $0x18] sm:$0xff]  ;;  %vm71_vm1 = vcmask 261120   ;;  %vm245_vm2 = vcmask 31744  }
  0x37   :  { %330 = vmatprep.subr.bf16.mxu1 %v439_v0  ;;  %321 = vmatprep.mubr.msk.f32.mxu1 %vm440_vm0, %v441_v1  ;;  %v325_v5 = vpack.c.bf16 %v61_v3, %v60_v2  ;;  %v146_v7 = vld [vmem:[#allocation6] sm:$0xff]  ;;  %v147_v8 = vld [vmem:[#allocation6 + $0x8] sm:$0xff]  ;;  %v148_v9 = vld [vmem:[#allocation6 + $0x10] sm:$0xff]  ;;  %v328_v11 = vpack.c.bf16 %v63_v6, %v62_v4 }
  0x38   :  { %v149_v10 = vld [vmem:[#allocation6 + $0x18] sm:$0xff]  ;;  %v331_v12 = vpack.c.bf16 %v147_v8, %v146_v7  ;;  %v150_v14 = vld [vmem:[#allocation6 + $0x20] sm:$0xff]  ;;  %v151_v15 = vld [vmem:[#allocation6 + $0x28] sm:$0xff] }
  0x39   :  { %326 = vmatpush3.bf16.msra.mxu0 %v325_v5  ;;  %v334_v13 = vpack.c.bf16 %v149_v10, %v148_v9  ;;  %v59_v16 = vld [vmem:[#allocation2] sm:$0xff]  ;;  %v337_v17 = vpack.c.bf16 %v151_v15, %v150_v14  ;;  %v152_v18 = vld [vmem:[#allocation6 + $0x30] sm:$0xff]  ;;  %v154_v21 = vld [vmem:[#allocation6 + $0x40] sm:$0xff] }
  0x3a   :  { %327 = vmatprep.subr.bf16.mxu0 %v439_v0  ;;  %332 = vmatpush3.bf16.msra.mxu1 %v331_v12  ;;  %v153_v19 = vld [vmem:[#allocation6 + $0x38] sm:$0xff]  ;;  %v155_v22 = vld [vmem:[#allocation6 + $0x48] sm:$0xff]  ;;  %v156_v24 = vld [vmem:[#allocation6 + $0x50] sm:$0xff] }
  0x3b   :  { %333 = vmatprep.subr.bf16.mxu1 %v439_v0  ;;  %v340_v20 = vpack.c.bf16 %v153_v19, %v152_v18  ;;  %v343_v23 = vpack.c.bf16 %v155_v22, %v154_v21  ;;  %v157_v25 = vld [vmem:[#allocation6 + $0x58] sm:$0xff]  ;;  %v158_v27 = vld [vmem:[#allocation6 + $0x60] sm:$0xff]  ;;  %v159_v28 = vld [vmem:[#allocation6 + $0x68] sm:$0xff] }
  0x3c   :  { %v346_v26 = vpack.c.bf16 %v157_v25, %v156_v24  ;;  %v349_v29 = vpack.c.bf16 %v159_v28, %v158_v27  ;;  %v160_v30 = vld [vmem:[#allocation6 + $0x70] sm:$0xff]  ;;  %v161_v31 = vld [vmem:[#allocation6 + $0x78] sm:$0xff] }
  0x3d   :  { %329 = vmatpush3.bf16.msra.mxu0 %v328_v11  ;;  %v352_v32 = vpack.c.bf16 %v161_v31, %v160_v30  ;;  %v253_v33 = vld [vmem:[%s525_s2] ss:$0 sm:$0xff] }
  0x3e   :  { %335 = vmatpush3.bf16.msra.mxu1 %v334_v13  ;;  %v255_v38 = vld [vmem:[%s527_s4] ss:$0 sm:$0xff] }
  0x3f   :  { %336 = vmatprep.subr.bf16.mxu1 %v439_v0 }
  0x40   :  { %287 = vmatmul.mubr.msk.f32.vlgmr.msra.gmra.mrb[0].mxu0 %vm71_vm1, %v59_v16 }
  0x42   :  { %338 = vmatpush3.bf16.msra.mxu1 %v337_v17 }
  0x43   :  { %339 = vmatprep.subr.bf16.mxu1 %v439_v0 }
  0x46   :  { %341 = vmatpush3.bf16.msra.mxu1 %v340_v20 }
  0x47   :  { %342 = vmatprep.subr.bf16.mxu1 %v439_v0 }
  0x4a   :  { %344 = vmatpush3.bf16.msra.mxu1 %v343_v23 }
  0x4b   :  { %345 = vmatprep.subr.bf16.mxu1 %v439_v0 }
  0x4e   :  { %347 = vmatpush3.bf16.msra.mxu1 %v346_v26 }
  0x4f   :  { %348 = vmatprep.subr.bf16.mxu1 %v439_v0 }
  0x52   :  { %350 = vmatpush3.bf16.msra.mxu1 %v349_v29 }
  0x53   :  { %351 = vmatprep.subr.bf16.mxu1 %v439_v0 }
  0x56   :  { %353 = vmatpush3.bf16.msra.mxu1 %v352_v32 }
 0x113   :  { %v141_v34 = vpop.f32.mrb[0].mxu0 }
 0x114   :  { %v142_v35 = vadd.f32 %v253_v33, %v141_v34  ;;  %v288_v36 = vpop.f32.mrb[1].mxu0 }
 0x116   :  { %v145_v37 = vmax.f32 %v142_v35, 0.0 }
 0x118   :  { %322 = vmatmul.mubr.f32.vlgmr.msra.gmra.mrb[0].mxu1 %v145_v37 }
 0x1eb   :  { %v235_v39 = vpop.f32.mrb[0].mxu1 }
 0x1ec   :  { %v236_v40 = vadd.f32 %v255_v38, %v235_v39  ;;  %v323_v41 = vpop.f32.mrb[1].mxu1 }
 0x1ee   :  { %v239_v42 = vand.u32 2147483647, %v236_v40 }
 0x1f0   :  { %240 = vadd.xlane.f32.xlu0 %v239_v42 }
 0x27d   :  { %v241_v43 = vpop.xlane.xlu0 %240 }
 0x27e   :  { %v242_v44 = vmax.f32 %v241_v43, 1.0 }
 0x280   :  { %362 = vrcp.f32 %v242_v44 }
 0x28a   :  { %v363_v45 = vpop.eup %362 }
 0x28b   :  { %v244_v46 = vmul.f32 %v363_v45, %v236_v40 }
 0x28d   :  { %246 = vst.msk [vmem:[%s528_s5] sm:$0xff] %vm245_vm2, %v244_v46 }
 0x28e   :  { %251 = vsyncpa [#allocation3], 1 }
 0x28f   :  { %252 = vsyncpa [#allocation5], 1 }

</bundles_post_ra>
